<compile_context>
chip_gen: v7x
topology: tpu7x:2x2x1
jax: 0.10.0
libtpu: 0.0.40
codegen_flags: <defaults>
</compile_context>

<pallas_src>
import functools

import jax
import jax.numpy as jnp
import numpy as np
from jax.experimental import pallas as pl
from jax.experimental.pallas import tpu as pltpu


def _round_up(x, m):
    return ((x + m - 1) // m) * m


def _vmem_capacity_bytes():
    """Per-core VMEM capacity; conservative 64 MiB (v7x-sized) fallback."""
    try:
        return int(pltpu.get_tpu_info().vmem_capacity_bytes)
    except Exception:
        return 64 * 1024 * 1024


def _pick_time_tile(T, stride, K, C_in, C_out, in_itemsize, out_itemsize,
                    target_rows, vmem_budget):
    """Largest (16*stride)-aligned time tile <= target_rows whose rough VMEM
    footprint (double-buffered in/out blocks + weight + f32 temporaries) fits
    vmem_budget.  16*stride keeps the bf16 input tile and the f32 pooled output
    tile sublane-aligned and keeps pool windows from straddling tiles."""
    align = 16 * stride
    tile = min(_round_up(T, align), max(align, (target_rows // align) * align))

    def footprint(t):
        in_blk = 2 * t * C_in * in_itemsize                       # double-buffered input
        halo_blk = 2 * max(K - 1, 1) * C_in * in_itemsize
        out_blk = 2 * (t // stride) * C_out * out_itemsize        # double-buffered output
        w_blk = 2 * K * C_in * C_out * in_itemsize                # constant block (still 2x)
        temps = (t + K) * C_in * in_itemsize + 3 * t * C_out * 4  # xwin + acc/LN temps
        return in_blk + halo_blk + out_blk + w_blk + temps

    while tile > align and footprint(tile) > vmem_budget:
        tile = max(align, ((tile // 2) // align) * align)
    return tile


def _make_convblock_kernel(T_tile, K, C_in, C_out, stride, eps, approx_gelu):
    T_out_tile = T_tile // stride
    inv_sqrt2 = 0.7071067811865475

    def kernel(x_ref, h_ref, w_ref, g_ref, b_ref, o_ref):
        # x_ref: (1, T_tile, C_in)      time-major activation rows (compute dtype)
        # h_ref: (1, 1, HK, C_in)       conv halo = first (K-1) rows of the next tile
        # w_ref: (K, C_in, C_out)       conv weight, tap-major (compute dtype)
        # g_ref, b_ref: (1, C_out)      LayerNorm affine (f32)
        # o_ref: (1, T_out_tile, C_out)
        x_main = x_ref[0]                                             # (T_tile, C_in)

        # ---- Conv1d (bias=False): K accumulating per-tap MXU matmuls ----
        # No f32 widen, no materialized im2col: LHS stays in the MXU compute dtype.
        acc = jnp.dot(x_main, w_ref[0], preferred_element_type=jnp.float32)
        if K > 1:
            xwin = jnp.concatenate([x_main, h_ref[0, 0]], axis=0)     # (T_tile+K-1, C_in)
            for k in range(1, K):
                acc += jnp.dot(xwin[k:k + T_tile, :], w_ref[k],
                               preferred_element_type=jnp.float32)     # (T_tile, C_out) f32

        # ---- LayerNorm over channels (lane axis): biased variance + affine ----
        mean = jnp.mean(acc, axis=-1, keepdims=True)
        centered = acc - mean
        var = jnp.mean(centered * centered, axis=-1, keepdims=True)
        y = centered * jax.lax.rsqrt(var + eps)
        y = y * g_ref[0].astype(jnp.float32) + b_ref[0].astype(jnp.float32)

        # ---- GELU ----
        if approx_gelu:
            # tanh approximation -> EUP slot (nearly free); tiny numerics delta vs torch.nn.GELU()
            c = 0.7978845608028654  # sqrt(2/pi)
            y = 0.5 * y * (1.0 + jnp.tanh(c * (y + 0.044715 * y * y * y)))
        else:
            y = 0.5 * y * (1.0 + jax.lax.erf(y * inv_sqrt2))           # exact, matches PyTorch

        # ---- Dropout: identity at inference ----

        # ---- MaxPool1d(kernel_size=stride, stride=stride): sublane-group max ----
        if stride > 1:
            y = jnp.max(y.reshape(T_out_tile, stride, C_out), axis=1)

        o_ref[0] = y.astype(o_ref.dtype)

    return kernel


def conv_block_forward(x, w, gamma, beta, *, stride, eps=1e-5,
                       compute_dtype=jnp.bfloat16, time_tile_target=None,
                       out_dtype=None, approx_gelu=False):
    """x: [B, C_in, T] (NCT).  w: [C_out, C_in, K] (PyTorch Conv1d layout).
    Returns [B, C_out, T // stride] (MaxPool1d floor semantics) in out_dtype (default x.dtype)."""
    B, C_in, T = x.shape
    C_out, C_in_w, K = w.shape
    assert C_in_w == C_in and stride >= 1 and K >= 1
    out_dtype = x.dtype if out_dtype is None else out_dtype
    T_out = T // stride
    assert T_out >= 1

    # 'same' padding split (matches PyTorch: left = (K-1) // 2)
    pad_l = (K - 1) // 2
    pad_r = K - 1 - pad_l

    # ---- generation-aware tile / VMEM sizing ----
    vmem_cap = _vmem_capacity_bytes()
    big_vmem = vmem_cap > (96 << 20)                    # 128 MiB parts (v5e/v6e) vs 64 MiB (v7x)
    vmem_limit = (64 << 20) if big_vmem else (48 << 20)
    if time_tile_target is None:
        time_tile_target = 1024 if big_vmem else 512
    T_tile = _pick_time_tile(T, stride, K, C_in, C_out,
                             np.dtype(compute_dtype).itemsize,
                             np.dtype(out_dtype).itemsize,
                             time_tile_target, (vmem_limit * 3) // 4)
    T_pad = _round_up(T, T_tile)                        # pad time instead of one-giant-block fallback
    n_tiles = T_pad // T_tile
    T_out_tile = T_tile // stride
    HK = max(K - 1, 1)

    # Host-side prep (fuses into one relayout pass under jit):
    # NCT -> time-major NTC, cast to the MXU compute dtype, zero-pad:
    #   left = pad_l ('same'), right = pad_r ('same') + (T_pad - T) (tile padding).
    xt = jnp.transpose(x, (0, 2, 1)).astype(compute_dtype)              # [B, T, C_in]
    xp = jnp.pad(xt, ((0, 0), (pad_l, pad_r + (T_pad - T)), (0, 0)))    # [B, T_pad+K-1, C_in]
    x_main = xp[:, :T_pad, :]                                           # [B, n_tiles*T_tile, C_in]
    if K > 1:
        idx = (jnp.arange(1, n_tiles + 1, dtype=jnp.int32) * T_tile)[:, None] \
              + jnp.arange(K - 1, dtype=jnp.int32)[None, :]             # (n_tiles, K-1)
        halo = jnp.take(xp, idx, axis=1)                                # [B, n_tiles, K-1, C_in]
    else:
        halo = jnp.zeros((B, n_tiles, HK, C_in), compute_dtype)

    # Conv weight, tap-major: w2[k, ci, co] = w[co, ci, k]
    w2 = jnp.transpose(w, (2, 1, 0)).astype(compute_dtype)              # (K, C_in, C_out)
    g2 = gamma.reshape(1, C_out).astype(jnp.float32)
    b2 = beta.reshape(1, C_out).astype(jnp.float32)

    kernel = _make_convblock_kernel(T_tile, K, C_in, C_out, stride, eps, approx_gelu)

    out = pl.pallas_call(
        kernel,
        out_shape=jax.ShapeDtypeStruct((B, T_pad // stride, C_out), out_dtype),
        grid_spec=pl.GridSpec(
            grid=(B, n_tiles),
            in_specs=[
                pl.BlockSpec((1, T_tile, C_in), lambda b, t: (b, t, 0)),
                pl.BlockSpec((1, 1, HK, C_in), lambda b, t: (b, t, 0, 0)),
                pl.BlockSpec((K, C_in, C_out), lambda b, t: (0, 0, 0)),
                pl.BlockSpec((1, C_out), lambda b, t: (0, 0)),
                pl.BlockSpec((1, C_out), lambda b, t: (0, 0)),
            ],
            out_specs=pl.BlockSpec((1, T_out_tile, C_out), lambda b, t: (b, t, 0)),
        ),
        compiler_params=pltpu.CompilerParams(
            dimension_semantics=("parallel", "parallel"),
            vmem_limit_bytes=vmem_limit,
        ),
    )(x_main, halo, w2, g2, b2)

    out = out[:, :T_out, :]                          # drop tile-pad rows (MaxPool floor semantics)
    return jnp.transpose(out, (0, 2, 1))             # [B, C_out, T_out]


def _reference(x, w, gamma, beta, *, stride, eps=1e-5, compute_dtype=jnp.float32):
    """Pure-JAX reference mirroring the PyTorch module (eval mode).
    compute_dtype sets the conv operand precision (f32 accumulation either way)."""
    y = jax.lax.conv_general_dilated(
        x.astype(compute_dtype), w.astype(compute_dtype), window_strides=(1,),
        padding="SAME", dimension_numbers=("NCH", "OIH", "NCH"),
        preferred_element_type=jnp.float32)                              # [B, C_out, T] f32
    yt = jnp.transpose(y, (0, 2, 1))
    mean = jnp.mean(yt, axis=-1, keepdims=True)
    var = jnp.mean((yt - mean) ** 2, axis=-1, keepdims=True)
    yt = (yt - mean) / jnp.sqrt(var + eps) * gamma + beta
    y = jnp.transpose(yt, (0, 2, 1))
    y = 0.5 * y * (1.0 + jax.lax.erf(y / jnp.sqrt(2.0)))                 # exact GELU
    B, C, T = y.shape
    if stride > 1:
        T_out = T // stride
        y = jnp.max(y[:, :, :T_out * stride].reshape(B, C, T_out, stride), axis=-1)
    return y.astype(x.dtype)


if __name__ == "__main__":
    key = jax.random.PRNGKey(0)

    # ---- Case 1: main shapes (default bf16-MXU path + strict f32-parity path) ----
    B, C_in, C_out, T, K, STRIDE = 2, 4, 8, 16, 3, 2
    k1, k2, k3, k4, key = jax.random.split(key, 5)
    x = jax.random.normal(k1, (B, C_in, T), jnp.float32)
    w = jax.random.normal(k2, (C_out, C_in, K), jnp.float32) * 0.2
    gamma = 1.0 + 0.05 * jax.random.normal(k3, (C_out,), jnp.float32)
    beta = 0.05 * jax.random.normal(k4, (C_out,), jnp.float32)

    fwd_bf16 = jax.jit(functools.partial(conv_block_forward, stride=STRIDE,
                                         compute_dtype=jnp.bfloat16))
    out = jax.block_until_ready(fwd_bf16(x, w, gamma, beta))
    assert out.shape == (B, C_out, T // STRIDE)
    ref_bf16 = _reference(x, w, gamma, beta, stride=STRIDE, compute_dtype=jnp.bfloat16)
    np.testing.assert_allclose(np.asarray(out), np.asarray(ref_bf16), rtol=2e-3, atol=2e-3)

    fwd_f32 = jax.jit(functools.partial(conv_block_forward, stride=STRIDE,
                                        compute_dtype=jnp.float32))
    out32 = jax.block_until_ready(fwd_f32(x, w, gamma, beta))
    ref32 = _reference(x, w, gamma, beta, stride=STRIDE)
    np.testing.assert_allclose(np.asarray(out32), np.asarray(ref32), rtol=1e-4, atol=1e-4)

    # ---- Case 2: T % stride != 0 and even K (MaxPool floor + asymmetric 'same' pad) ----
    B2, Ci2, Co2, T2, K2, S2 = 2, 5, 16, 15, 4, 2
    k1, k2, k3, k4, key = jax.random.split(key, 5)
    x2 = jax.random.normal(k1, (B2, Ci2, T2), jnp.float32)
    wt2 = jax.random.normal(k2, (Co2, Ci2, K2), jnp.float32) * 0.2
    gm2 = 1.0 + 0.05 * jax.random.normal(k3, (Co2,), jnp.float32)
    bt2 = 0.05 * jax.random.normal(k4, (Co2,), jnp.float32)
    fwd2 = jax.jit(functools.partial(conv_block_forward, stride=S2,
                                     compute_dtype=jnp.float32))
    out2 = jax.block_until_ready(fwd2(x2, wt2, gm2, bt2))
    assert out2.shape == (B2, Co2, T2 // S2)
    ref2 = _reference(x2, wt2, gm2, bt2, stride=S2)
    np.testing.assert_allclose(np.asarray(out2), np.asarray(ref2), rtol=1e-4, atol=1e-4)

    print("KERNEL_OK")
</pallas_src>

<mosaic_0001>
module attributes {stable_mosaic.version = 11 : i64} {
  func.func @kernel(%arg0: i32, %arg1: i32, %arg2: memref<1x32x4xbf16, #tpu.memory_space<vmem>>, %arg3: memref<1x1x2x4xbf16, #tpu.memory_space<vmem>>, %arg4: memref<3x4x8xbf16, #tpu.memory_space<vmem>>, %arg5: memref<1x8xf32, #tpu.memory_space<vmem>>, %arg6: memref<1x8xf32, #tpu.memory_space<vmem>>, %arg7: memref<1x16x8xf32, #tpu.memory_space<vmem>>) attributes {dimension_semantics = [#tpu.dimension_semantics<parallel>, #tpu.dimension_semantics<parallel>], iteration_bounds = array<i64: 2, 1>, scalar_prefetch = 0 : i64, scratch_operands = 0 : i64, tpu.core_type = #tpu.core_type<tc>, window_params = [{transform_indices = @transform_0, window_bounds = array<i64: 1, 32, 4>}, {transform_indices = @transform_1, window_bounds = array<i64: 1, 1, 2, 4>}, {pipeline_mode = #tpu.pipeline_mode<synchronous>, transform_indices = @transform_2, window_bounds = array<i64: 3, 4, 8>}, {pipeline_mode = #tpu.pipeline_mode<synchronous>, transform_indices = @transform_3, window_bounds = array<i64: 1, 8>}, {pipeline_mode = #tpu.pipeline_mode<synchronous>, transform_indices = @transform_4, window_bounds = array<i64: 1, 8>}, {transform_indices = @transform_5, window_bounds = array<i64: 1, 16, 8>}]} {
    %c0 = arith.constant 0 : index
    %c0_0 = arith.constant 0 : index
    %c0_1 = arith.constant 0 : index
    %0 = vector.load %arg2[%c0, %c0_0, %c0_1] : memref<1x32x4xbf16, #tpu.memory_space<vmem>>, vector<1x32x4xbf16>
    %1 = vector.shape_cast %0 : vector<1x32x4xbf16> to vector<32x4xbf16>
    %c0_2 = arith.constant 0 : index
    %c0_3 = arith.constant 0 : index
    %c0_4 = arith.constant 0 : index
    %2 = vector.load %arg4[%c0_2, %c0_3, %c0_4] : memref<3x4x8xbf16, #tpu.memory_space<vmem>>, vector<1x4x8xbf16>
    %3 = vector.shape_cast %2 : vector<1x4x8xbf16> to vector<4x8xbf16>
    %cst = arith.constant dense<0.000000e+00> : vector<32x8xf32>
    %4 = tpu.matmul %1, %3, %cst {dimension_numbers = #tpu.dot_dimension_numbers<[1], [0], [0], [1], [0, 0, 1, 1], [], []>} : vector<32x4xbf16>, vector<4x8xbf16>, vector<32x8xf32> -> vector<32x8xf32>
    %c0_5 = arith.constant 0 : index
    %c0_6 = arith.constant 0 : index
    %c0_7 = arith.constant 0 : index
    %c0_8 = arith.constant 0 : index
    %5 = vector.load %arg3[%c0_5, %c0_6, %c0_7, %c0_8] : memref<1x1x2x4xbf16, #tpu.memory_space<vmem>>, vector<1x1x2x4xbf16>
    %6 = vector.shape_cast %5 : vector<1x1x2x4xbf16> to vector<2x4xbf16>
    %7 = tpu.concatenate %1, %6 in 0 : vector<32x4xbf16>, vector<2x4xbf16> -> vector<34x4xbf16>
    %8 = vector.extract_strided_slice %7 {offsets = [1, 0], sizes = [32, 4], strides = [1, 1]} : vector<34x4xbf16> to vector<32x4xbf16>
    %c1 = arith.constant 1 : index
    %c0_9 = arith.constant 0 : index
    %c0_10 = arith.constant 0 : index
    %9 = vector.load %arg4[%c1, %c0_9, %c0_10] : memref<3x4x8xbf16, #tpu.memory_space<vmem>>, vector<1x4x8xbf16>
    %10 = vector.shape_cast %9 : vector<1x4x8xbf16> to vector<4x8xbf16>
    %cst_11 = arith.constant dense<0.000000e+00> : vector<32x8xf32>
    %11 = tpu.matmul %8, %10, %cst_11 {dimension_numbers = #tpu.dot_dimension_numbers<[1], [0], [0], [1], [0, 0, 1, 1], [], []>} : vector<32x4xbf16>, vector<4x8xbf16>, vector<32x8xf32> -> vector<32x8xf32>
    %12 = arith.addf %4, %11 : vector<32x8xf32>
    %13 = vector.extract_strided_slice %7 {offsets = [2, 0], sizes = [32, 4], strides = [1, 1]} : vector<34x4xbf16> to vector<32x4xbf16>
    %c2 = arith.constant 2 : index
    %c0_12 = arith.constant 0 : index
    %c0_13 = arith.constant 0 : index
    %14 = vector.load %arg4[%c2, %c0_12, %c0_13] : memref<3x4x8xbf16, #tpu.memory_space<vmem>>, vector<1x4x8xbf16>
    %15 = vector.shape_cast %14 : vector<1x4x8xbf16> to vector<4x8xbf16>
    %cst_14 = arith.constant dense<0.000000e+00> : vector<32x8xf32>
    %16 = tpu.matmul %13, %15, %cst_14 {dimension_numbers = #tpu.dot_dimension_numbers<[1], [0], [0], [1], [0, 0, 1, 1], [], []>} : vector<32x4xbf16>, vector<4x8xbf16>, vector<32x8xf32> -> vector<32x8xf32>
    %17 = arith.addf %12, %16 : vector<32x8xf32>
    %cst_15 = arith.constant dense<0.000000e+00> : vector<32xf32>
    %18 = vector.multi_reduction <add>, %17, %cst_15 [1] : vector<32x8xf32> to vector<32xf32>
    %19 = vector.shape_cast %18 : vector<32xf32> to vector<32x1xf32>
    %cst_16 = arith.constant 8.000000e+00 : f32
    %20 = vector.broadcast %cst_16 : f32 to vector<32x1xf32>
    %21 = arith.divf %19, %20 : vector<32x1xf32>
    %22 = vector.broadcast %21 : vector<32x1xf32> to vector<32x8xf32>
    %23 = arith.subf %17, %22 : vector<32x8xf32>
    %24 = arith.mulf %23, %23 : vector<32x8xf32>
    %cst_17 = arith.constant dense<0.000000e+00> : vector<32xf32>
    %25 = vector.multi_reduction <add>, %24, %cst_17 [1] : vector<32x8xf32> to vector<32xf32>
    %26 = vector.shape_cast %25 : vector<32xf32> to vector<32x1xf32>
    %cst_18 = arith.constant 8.000000e+00 : f32
    %27 = vector.broadcast %cst_18 : f32 to vector<32x1xf32>
    %28 = arith.divf %26, %27 : vector<32x1xf32>
    %cst_19 = arith.constant 9.99999974E-6 : f32
    %29 = vector.broadcast %cst_19 : f32 to vector<32x1xf32>
    %30 = arith.addf %28, %29 : vector<32x1xf32>
    %31 = math.rsqrt %30 : vector<32x1xf32>
    %32 = vector.broadcast %31 : vector<32x1xf32> to vector<32x8xf32>
    %33 = arith.mulf %23, %32 : vector<32x8xf32>
    %c0_20 = arith.constant 0 : index
    %c0_21 = arith.constant 0 : index
    %34 = vector.load %arg5[%c0_20, %c0_21] : memref<1x8xf32, #tpu.memory_space<vmem>>, vector<1x8xf32>
    %35 = vector.shape_cast %34 : vector<1x8xf32> to vector<8xf32>
    %36 = vector.shape_cast %35 : vector<8xf32> to vector<1x8xf32>
    %37 = vector.broadcast %36 : vector<1x8xf32> to vector<32x8xf32>
    %38 = arith.mulf %33, %37 : vector<32x8xf32>
    %c0_22 = arith.constant 0 : index
    %c0_23 = arith.constant 0 : index
    %39 = vector.load %arg6[%c0_22, %c0_23] : memref<1x8xf32, #tpu.memory_space<vmem>>, vector<1x8xf32>
    %40 = vector.shape_cast %39 : vector<1x8xf32> to vector<8xf32>
    %41 = vector.shape_cast %40 : vector<8xf32> to vector<1x8xf32>
    %42 = vector.broadcast %41 : vector<1x8xf32> to vector<32x8xf32>
    %43 = arith.addf %38, %42 : vector<32x8xf32>
    %cst_24 = arith.constant 5.000000e-01 : f32
    %44 = vector.broadcast %cst_24 : f32 to vector<32x8xf32>
    %45 = arith.mulf %44, %43 : vector<32x8xf32>
    %cst_25 = arith.constant 0.707106769 : f32
    %46 = vector.broadcast %cst_25 : f32 to vector<32x8xf32>
    %47 = arith.mulf %43, %46 : vector<32x8xf32>
    %48 = math.erf %47 : vector<32x8xf32>
    %cst_26 = arith.constant 1.000000e+00 : f32
    %49 = vector.broadcast %cst_26 : f32 to vector<32x8xf32>
    %50 = arith.addf %49, %48 : vector<32x8xf32>
    %51 = arith.mulf %45, %50 : vector<32x8xf32>
    %52 = vector.shape_cast %51 : vector<32x8xf32> to vector<16x2x8xf32>
    %cst_27 = arith.constant dense<0xFF800000> : vector<16x8xf32>
    %53 = vector.multi_reduction <maximumf>, %52, %cst_27 [1] : vector<16x2x8xf32> to vector<16x8xf32>
    %c0_28 = arith.constant 0 : index
    %c0_29 = arith.constant 0 : index
    %c0_30 = arith.constant 0 : index
    %54 = vector.load %arg7[%c0_28, %c0_29, %c0_30] : memref<1x16x8xf32, #tpu.memory_space<vmem>>, vector<1x16x8xf32>
    %55 = vector.shape_cast %54 : vector<1x16x8xf32> to vector<16x8xf32>
    %56 = vector.shape_cast %53 : vector<16x8xf32> to vector<1x16x8xf32>
    tpu.vector_store %arg7[%c0_28, %c0_29, %c0_30], %56 {strides = array<i32>} : memref<1x16x8xf32, #tpu.memory_space<vmem>>, vector<1x16x8xf32>,
    return
  }
  func.func @transform_0(%arg0: i32, %arg1: i32) -> (i32, i32, i32) {
    %c0_i32 = arith.constant 0 : i32
    %c0_i32_0 = arith.constant 0 : i32
    return %arg0, %arg1, %c0_i32 : i32, i32, i32
  }
  func.func @transform_1(%arg0: i32, %arg1: i32) -> (i32, i32, i32, i32) {
    %c0_i32 = arith.constant 0 : i32
    %c0_i32_0 = arith.constant 0 : i32
    %c0_i32_1 = arith.constant 0 : i32
    return %arg0, %arg1, %c0_i32, %c0_i32_0 : i32, i32, i32, i32
  }
  func.func @transform_2(%arg0: i32, %arg1: i32) -> (i32, i32, i32) {
    %c0_i32 = arith.constant 0 : i32
    %c0_i32_0 = arith.constant 0 : i32
    %c0_i32_1 = arith.constant 0 : i32
    %c0_i32_2 = arith.constant 0 : i32
    return %c0_i32, %c0_i32_0, %c0_i32_1 : i32, i32, i32
  }
  func.func @transform_3(%arg0: i32, %arg1: i32) -> (i32, i32) {
    %c0_i32 = arith.constant 0 : i32
    %c0_i32_0 = arith.constant 0 : i32
    %c0_i32_1 = arith.constant 0 : i32
    return %c0_i32, %c0_i32_0 : i32, i32
  }
  func.func @transform_4(%arg0: i32, %arg1: i32) -> (i32, i32) {
    %c0_i32 = arith.constant 0 : i32
    %c0_i32_0 = arith.constant 0 : i32
    %c0_i32_1 = arith.constant 0 : i32
    return %c0_i32, %c0_i32_0 : i32, i32
  }
  func.func @transform_5(%arg0: i32, %arg1: i32) -> (i32, i32, i32) {
    %c0_i32 = arith.constant 0 : i32
    %c0_i32_0 = arith.constant 0 : i32
    return %arg0, %arg1, %c0_i32 : i32, i32, i32
  }
}

</mosaic_0001>

<bundles_post_ra>
// kernel: conv_block_forward.1
= control target key start
LH: loop header
LB: loop body
LE: loop exit
PB: predicated region body
PF: predicated region fallthrough
CT: control target
= control target key end

     0   :  { %s1114_s18 = smov 0   ;;  %s1116_s19 = smov 0   ;;  %s1244_s0 = inlined_call_operand.vmem [shape: bf16[2,32,4], index: 0, kind: input, shape index: {}]   ;;  %s1245_s1 = inlined_call_operand.vmem [shape: bf16[2,1,2,4], index: 1, kind: input, shape index: {}]   ;;  %s1246_s2 = inlined_call_operand.vmem [shape: bf16[3,4,8], index: 2, kind: input, shape index: {}]   ;;  %s1247_s3 = inlined_call_operand.vmem [shape: f32[1,8], index: 3, kind: input, shape index: {}]   ;;  %s1248_s4 = inlined_call_operand.vmem [shape: f32[1,8], index: 4, kind: input, shape index: {}]   ;;  %s1249_s5 = inlined_call_operand.vmem [shape: f32[2,16,8], index: 5, kind: output, shape index: {}]  }
   0x1   :  { %s1118_s20 = smov 0  }
   0x2 LB: > { %s27_s21 = sadd.s32 1, %s1077_s19  ;;  %p957_p0 = scmp.ge.s32.totalorder %s1081_s20, 1  ;;  %s1081_s20 = sphi %s1118_s20, %s15_s20   ;;  %s1077_s19 = sphi %s1116_s19, %s1251_s19   ;;  %s1073_s18 = sphi %s1114_s18, %s1250_s18  }
   0x3   : > { %p29_p1 = scmp.ge.s32.totalorder %s27_s21, 2  ;;  %p221_p2 = scmp.lt.s32.totalorder %s1081_s20, 3 }
   0x5   : > { %s1253_s21 = smov (%p29_p1, %s27_s21), 0  ;;  %p222_p3 = pnand %p957_p0, %p221_p2 }
   0x6   : > { %v294_v0 = vld [vmem:[%s1246_s2] sm:$0x3] (!%p222_p3)  ;;  %vm336_vm0 = vcmask (!%p222_p3), 1041408   ;;  %p264_p4 = scmp.lt.s32.totalorder (!%p222_p3), %s1073_s18, 1  ;;  %v969_v2 = vld [vmem:[%s1246_s2 + $0x4] sm:$0x3] (!%p222_p3) }
   0x7   : > { %225 = sbr.rel (%p222_p3) target bundleno = 625 (0x271), region = 40  ;;  %1014 = vmatprep.subr.msk.bf16.mxu0 (!%p222_p3), %vm336_vm0, %v294_v0  ;;  %v394_v1 = vsel (!%p222_p3), %vm336_vm0, %v294_v0, 0  ;;  %v964_v3 = vld [vmem:[%s1246_s2 + $0x2] sm:$0x3] (!%p222_p3)  ;;  %vm329_vm1 = vcmask (!%p222_p3), 31744   ;;  %v461_v7 = vsel (!%p222_p3), %vm336_vm0, %v969_v2, 0 }
   0x8   : > { %994 = vmatpush3.bf16.msra.mxu0 (!%p222_p3), %v394_v1  ;;  %1013 = vmatprep.subr.msk.bf16.mxu1 (!%p222_p3), %vm336_vm0, %v964_v3  ;;  %v338_v4 = vsel (!%p222_p3), %vm336_vm0, %v964_v3, 0  ;;  %vm448_vm2 = vcmask (!%p222_p3), 1046528   ;;  %vm308_vm3 = vsmask.f32 (!%p222_p3), 7424  ;;  %vm516_vm4 = vcmask (!%p222_p3), 64512  }
   0x9   : > { %1015 = vmatprep.subr.msk.bf16.mxu0 (!%p222_p3), %vm336_vm0, %v969_v2  ;;  %988 = vmatpush3.bf16.msra.mxu1 (!%p222_p3), %v338_v4  ;;  %vm700_vm5 = vcmask (!%p222_p3), 58368   ;;  %vm829_vm6 = vcmask (!%p222_p3), 1041409   ;;  %vm831_vm7 = vcmask (!%p222_p3), 1042434   ;;  %vm833_vm8 = vcmask (!%p222_p3), 1043459  }
   0xa   : > { %vm835_vm9 = vcmask (!%p222_p3), 1044484   ;;  %vm837_vm10 = vcmask (!%p222_p3), 1045509   ;;  %vm839_vm11 = vcmask (!%p222_p3), 1046534   ;;  %vm841_vm12 = vcmask (!%p222_p3), 1047559  }
   0xe   : > { %s1255_s18 = smov (!%p264_p4, %s1073_s18), 1 }
   0xf   : > { %s976_s28 = sshll.u32 %s1255_s18, 4  ;;  %s278_s6 = scalar_lea.vmem %s1245_s1, %s1255_s18 }
  0x10   : > { %s271_s9 = scalar_lea.vmem %s1244_s0, %s976_s28  ;;  %v295_v5 = vld [vmem:[%s278_s6] sm:$0x1]  ;;  %s1212_s16 = scalar_lea.vmem %s1249_s5, %s976_s28 }
  0x11   : > { %v1041_v6 = vld [vmem:[%s271_s9] sm:$0xff]   ;;  %v1042_v8 = vld [vmem:[%s271_s9 + $0x8] sm:$0xff]   ;;  %v325_v9 = vshll.u32 %v295_v5, 16  ;;  %v452_v23 = vrot.slane %v295_v5, 1 }
  0x12   : > { %995 = vmatprep.mubr.msk.bf16.mxu0 %vm329_vm1, %v1041_v6  ;;  %v310_v10 = vshrl.u32 %v1041_v6, 16  ;;  %v312_v11 = vshll.u32 %v1041_v6, 16  ;;  %v449_v12 = vrot.slane %v1041_v6, 1  ;;  %v317_v13 = vshll.u32 %v1042_v8, 16 }
  0x13   : > { %996 = vmatmul.mubr.msk.bf16.vlgmr.msra.gmra.mrb[0].mxu0 %vm329_vm1, %v1042_v8  ;;  %v321_v14 = vshrl.u32 %v1042_v8, 16  ;;  %v450_v15 = vrot.slane %v1042_v8, 1  ;;  %v327_v18 = vrot.slane %v325_v9, 1 }
  0x14   : > { %1000 = vmatpush3.bf16.msra.mxu0 %v461_v7  ;;  %v314_v16 = vrot.slane %v312_v11, 1  ;;  %v319_v17 = vrot.slane %v317_v13, 1  ;;  %v972_v11 = vld [vmem:[%s1247_s3] ss:$0 sm:$0xff] }
  0x15   : > { %v451_v19 = vsel %vm448_vm2, %v449_v12, %v450_v15  ;;  %v453_v25 = vsel %vm448_vm2, %v450_v15, %v452_v23  ;;  %v973_v13 = vld [vmem:[%s1248_s4] ss:$0 sm:$0xff] }
  0x16   : > { %v315_v20 = vor.u32 %v314_v16, %v310_v10  ;;  %1001 = vmatprep.mubr.msk.bf16.mxu0 %vm329_vm1, %v451_v19  ;;  %v323_v21 = vor.u32 %v321_v14, %v319_v17 }
  0x18   : > { %v320_v22 = vsel %vm308_vm3, %v315_v20, %v319_v17  ;;  %v328_v24 = vsel %vm308_vm3, %v323_v21, %v327_v18 }
  0x19   : > { %989 = vmatprep.mubr.msk.bf16.mxu1 %vm329_vm1, %v320_v22 }
  0x1a   : > { %990 = vmatmul.mubr.msk.bf16.vlgmr.msra.gmra.mrb[0].mxu1 %vm329_vm1, %v328_v24 }
  0x1f   : > { %1002 = vmatmul.mubr.msk.bf16.vlgmr.msra.gmra.mrb[0].mxu0 %vm329_vm1, %v453_v25 }
  0xed   : > { %v991_v26 = vpop.f32.mrb[0].mxu1 }
  0xee   : > { %v374_v27 = vpop.f32.mrb[1].mxu1 }
  0xef   : > { %v992_v28 = vpop.f32.mrb[2].mxu1 }
  0xf0   : > { %v377_v29 = vpop.f32.mrb[3].mxu1 }
  0xf2   : > { %v1003_v30 = vpop.f32.mrb[0].mxu0 }
  0xf3   : > { %v1005_v31 = vadd.f32 %v1003_v30, %v991_v26  ;;  %v497_v32 = vpop.f32.mrb[1].mxu0  ;;  %v620_v30 = vlaneseq }
  0xf4   : > { %v1006_v33 = vadd.f32 %v497_v32, %v374_v27  ;;  %v1004_v34 = vpop.f32.mrb[2].mxu0 }
  0xf5   : > { %v1007_v35 = vadd.f32 %v1004_v34, %v992_v28  ;;  %v500_v36 = vpop.f32.mrb[3].mxu0  ;;  %v523_v40 = vsel %vm516_vm4, %v1005_v31, 0.0  ;;  %v1083_v28 = vmov 1983009808   ;;  %v621_v34 = vshrl.u32 %v620_v30, 7 }
  0xf6   : > { %v1008_v37 = vadd.f32 %v500_v36, %v377_v29  ;;  %v517_v38 = vsel %vm516_vm4, %v1006_v33, 0.0  ;;  %v618_v29 = vunpack.c.l.s4 %v1083_v28 }
  0xf7   : > { %518 = vadd.xlane.f32.xlu0 %v517_v38  ;;  %v526_v41 = vsel %vm516_vm4, %v1007_v35, 0.0 }
  0xf8   : > { %v520_v39 = vsel %vm516_vm4, %v1008_v37, 0.0 }
  0xf9   : > { %521 = vadd.xlane.f32.xlu1 %v520_v39 }
  0xfb   : > { %524 = vadd.xlane.f32.xlu0 %v523_v40 }
  0xfd   : > { %527 = vadd.xlane.f32.xlu1 %v526_v41 }
 0x184   : > { %v519_v42 = vpop.xlane.xlu0 %518 }
 0x185   : > { %v530_v43 = vmul.f32 0.125, %v519_v42 }
 0x186   : > { %v522_v44 = vpop.xlane.xlu1 %521 }
 0x187   : > { %v534_v45 = vsub.f32 %v1006_v33, %v530_v43  ;;  %v531_v46 = vmul.f32 0.125, %v522_v44  ;;  %v619_v33 = vunpack.c.0.s8 %v618_v29 }
 0x188   : > { %v525_v47 = vpop.xlane.xlu0 %524 }
 0x189   : > { %v535_v48 = vsub.f32 %v1008_v37, %v531_v46  ;;  %v532_v49 = vmul.f32 0.125, %v525_v47  ;;  %v538_v50 = vmul.f32 %v534_v45, %v534_v45  ;;  %v1181_v37 = vsub.s32 %v619_v33, %v621_v34 }
 0x18a   : > { %v528_v51 = vpop.xlane.xlu1 %527 }
 0x18b   : > { %v536_v52 = vsub.f32 %v1005_v31, %v532_v49  ;;  %v533_v53 = vmul.f32 0.125, %v528_v51  ;;  %v542_v54 = vsel %vm516_vm4, %v538_v50, 0.0  ;;  %v539_v55 = vmul.f32 %v535_v48, %v535_v48 }
 0x18c   : > { %543 = vadd.xlane.f32.xlu0 %v542_v54 }
 0x18d   : > { %v537_v56 = vsub.f32 %v1007_v35, %v533_v53  ;;  %v540_v57 = vmul.f32 %v536_v52, %v536_v52  ;;  %v545_v59 = vsel %vm516_vm4, %v539_v55, 0.0 }
 0x18f   : > { %v548_v58 = vsel %vm516_vm4, %v540_v57, 0.0  ;;  %v541_v60 = vmul.f32 %v537_v56, %v537_v56 }
 0x190   : > { %549 = vadd.xlane.f32.xlu1 %v548_v58  ;;  %546 = vadd.xlane.f32.xlu0 %v545_v59 }
 0x191   : > { %v551_v61 = vsel %vm516_vm4, %v541_v60, 0.0 }
 0x194   : > { %552 = vadd.xlane.f32.xlu1 %v551_v61 }
 0x219   : > { %v544_v62 = vpop.xlane.xlu0 %543 }
 0x21a   : > { %v554_v63 = vmul.f32 0.125, %v544_v62 }
 0x21c   : > { %v558_v0 = vadd.f32 1e-05, %v554_v63 }
 0x21d   : > { %v547_v1 = vpop.xlane.xlu0 %546  ;;  %v550_v2 = vpop.xlane.xlu1 %549 }
 0x21e   : > { %1043 = vrsqrt.f32 %v558_v0  ;;  %v555_v3 = vmul.f32 0.125, %v547_v1  ;;  %v556_v4 = vmul.f32 0.125, %v550_v2 }
 0x220   : > { %v559_v5 = vadd.f32 1e-05, %v555_v3  ;;  %v560_v6 = vadd.f32 1e-05, %v556_v4 }
 0x221   : > { %v553_v7 = vpop.xlane.xlu1 %552 }
 0x222   : > { %1045 = vrsqrt.f32 %v559_v5  ;;  %v557_v8 = vmul.f32 0.125, %v553_v7 }
 0x223   : > { %1047 = vrsqrt.f32 %v560_v6 }
 0x224   : > { %v561_v9 = vadd.f32 1e-05, %v557_v8 }
 0x226   : > { %1049 = vrsqrt.f32 %v561_v9 }
 0x228   : > { %v1044_v10 = vpop.eup %1043 }
 0x229   : > { %v566_v12 = vmul.f32 %v1044_v10, %v534_v45 }
 0x22b   : > { %v577_v14 = vmul.f32 %v972_v11, %v566_v12 }
 0x22c   : > { %v1046_v15 = vpop.eup %1045 }
 0x22d   : > { %v1048_v16 = vpop.eup %1047  ;;  %v588_v17 = vadd.f32 %v973_v13, %v577_v14  ;;  %v567_v18 = vmul.f32 %v1046_v15, %v535_v48 }
 0x22e   : > { %v568_v19 = vmul.f32 %v1048_v16, %v536_v52 }
 0x22f   : > { %v596_v20 = vmul.f32 0.70710677, %v588_v17  ;;  %v578_v21 = vmul.f32 %v972_v11, %v567_v18  ;;  %v592_v38 = vmul.f32 0.5, %v588_v17 }
 0x230   : > { %v1050_v22 = vpop.eup %1049  ;;  %v579_v23 = vmul.f32 %v972_v11, %v568_v19 }
 0x231   : > { %1051 = verf.f32 %v596_v20  ;;  %v589_v24 = vadd.f32 %v973_v13, %v578_v21  ;;  %v569_v27 = vmul.f32 %v1050_v22, %v537_v56 }
 0x232   : > { %v590_v25 = vadd.f32 %v973_v13, %v579_v23 }
 0x233   : > { %v597_v26 = vmul.f32 0.70710677, %v589_v24  ;;  %v580_v32 = vmul.f32 %v972_v11, %v569_v27  ;;  %v593_v46 = vmul.f32 0.5, %v589_v24 }
 0x234   : > { %v598_v31 = vmul.f32 0.70710677, %v590_v25  ;;  %v594_v48 = vmul.f32 0.5, %v590_v25 }
 0x235   : > { %1053 = verf.f32 %v597_v26  ;;  %v591_v36 = vadd.f32 %v973_v13, %v580_v32 }
 0x236   : > { %1055 = verf.f32 %v598_v31 }
 0x237   : > { %v599_v42 = vmul.f32 0.70710677, %v591_v36  ;;  %v1186_v56 = vmul.f32 0.5, %v591_v36 }
 0x239   : > { %1057 = verf.f32 %v599_v42 }
 0x23b   : > { %v1052_v35 = vpop.eup %1051 }
 0x23c   : > { %v604_v39 = vadd.f32 1.0, %v1052_v35 }
 0x23e   : > { %v608_v40 = vmul.f32 %v604_v39, %v592_v38 }
 0x23f   : > { %v1054_v41 = vpop.eup %1053 }
 0x240   : > { %v1056_v43 = vpop.eup %1055  ;;  %v616_v44 = vcombine.high %v608_v40, %v608_v40  ;;  %v623_v45 = vrot.slane %v608_v40, %v1181_v37  ;;  %v605_v47 = vadd.f32 1.0, %v1054_v41 }
 0x241   : > { %v606_v49 = vadd.f32 1.0, %v1056_v43 }
 0x242   : > { %v630_v50 = vrot.slane %v616_v44, %v1181_v37  ;;  %v631_v51 = vcombine.high %v623_v45, %v623_v45  ;;  %v701_v52 = vsel %vm700_vm5, %v623_v45, -inf  ;;  %v609_v53 = vmul.f32 %v605_v47, %v593_v46 }
 0x243   : > { %v702_v54 = vrot.slane %v701_v52, 4  ;;  %v610_v55 = vmul.f32 %v606_v49, %v594_v48  ;;  %v1058_v29 = vpop.eup %1057 }
 0x244   : > { %v632_v57 = vcombine.high %v630_v50, %v630_v50  ;;  %v708_v58 = vsel %vm700_vm5, %v631_v51, -inf  ;;  %v715_v59 = vsel %vm700_vm5, %v630_v50, -inf  ;;  %v633_v60 = vcombine.high %v609_v53, %v609_v53 }
 0x245   : > { %v703_v61 = vmax.f32 %v701_v52, %v702_v54  ;;  %v709_v62 = vrot.slane %v708_v58, 4  ;;  %v716_v63 = vrot.slane %v715_v59, 4  ;;  %v640_v0 = vrot.slane %v609_v53, %v1181_v37 }
 0x246   : > { %v722_v1 = vsel %vm700_vm5, %v632_v57, -inf  ;;  %v647_v2 = vrot.slane %v633_v60, %v1181_v37  ;;  %v650_v3 = vcombine.high %v610_v55, %v610_v55  ;;  %v657_v4 = vrot.slane %v610_v55, %v1181_v37 }
 0x247   : > { %v704_v5 = vrot.slane %v703_v61, 2  ;;  %v710_v6 = vmax.f32 %v708_v58, %v709_v62  ;;  %v717_v7 = vmax.f32 %v715_v59, %v716_v63  ;;  %v723_v8 = vrot.slane %v722_v1, 4 }
 0x248   : > { %v648_v9 = vcombine.high %v640_v0, %v640_v0  ;;  %v649_v10 = vcombine.high %v647_v2, %v647_v2  ;;  %v729_v11 = vsel %vm700_vm5, %v640_v0, -inf  ;;  %v743_v12 = vsel %vm700_vm5, %v647_v2, -inf }
 0x249   : > { %v705_v13 = vmax.f32 %v703_v61, %v704_v5  ;;  %v711_v14 = vrot.slane %v710_v6, 2  ;;  %v718_v15 = vrot.slane %v717_v7, 2  ;;  %v724_v16 = vmax.f32 %v722_v1, %v723_v8 }
 0x24a   : > { %v730_v17 = vrot.slane %v729_v11, 4  ;;  %v736_v18 = vsel %vm700_vm5, %v648_v9, -inf  ;;  %v744_v19 = vrot.slane %v743_v12, 4  ;;  %v750_v20 = vsel %vm700_vm5, %v649_v10, -inf }
 0x24b   : > { %v706_v21 = vrot.slane %v705_v13, 1  ;;  %v712_v22 = vmax.f32 %v710_v6, %v711_v14  ;;  %v719_v23 = vmax.f32 %v717_v7, %v718_v15  ;;  %v725_v24 = vrot.slane %v724_v16, 2 }
 0x24c   : > { %v731_v25 = vmax.f32 %v729_v11, %v730_v17  ;;  %v737_v26 = vrot.slane %v736_v18, 4  ;;  %v745_v27 = vmax.f32 %v743_v12, %v744_v19  ;;  %v751_v28 = vrot.slane %v750_v20, 4 }
 0x24d   : > { %v707_v30 = vmax.f32 %v705_v13, %v706_v21  ;;  %v713_v31 = vrot.slane %v712_v22, 1  ;;  %v720_v32 = vrot.slane %v719_v23, 1  ;;  %v726_v33 = vmax.f32 %v724_v16, %v725_v24 }
 0x24e   : > { %v732_v34 = vrot.slane %v731_v25, 2  ;;  %v738_v35 = vmax.f32 %v736_v18, %v737_v26  ;;  %v746_v36 = vrot.slane %v745_v27, 2  ;;  %v752_v38 = vmax.f32 %v750_v20, %v751_v28 }
 0x24f   : > { %v714_v39 = vmax.f32 %v712_v22, %v713_v31  ;;  %v721_v40 = vmax.f32 %v719_v23, %v720_v32  ;;  %v727_v41 = vrot.slane %v726_v33, 1  ;;  %v664_v42 = vrot.slane %v650_v3, %v1181_v37 }
 0x250   : > { %v733_v43 = vmax.f32 %v731_v25, %v732_v34  ;;  %v739_v44 = vrot.slane %v738_v35, 2  ;;  %v747_v45 = vmax.f32 %v745_v27, %v746_v36  ;;  %v753_v46 = vrot.slane %v752_v38, 2 }
 0x251   : > { %v728_v47 = vmax.f32 %v726_v33, %v727_v41  ;;  %v830_v48 = vsel %vm829_vm6, %v714_v39, %v707_v30  ;;  %v665_v49 = vcombine.high %v657_v4, %v657_v4  ;;  %v666_v50 = vcombine.high %v664_v42, %v664_v42 }
 0x252   : > { %v832_v51 = vsel %vm831_vm7, %v721_v40, %v830_v48  ;;  %v734_v52 = vrot.slane %v733_v43, 1  ;;  %v740_v53 = vmax.f32 %v738_v35, %v739_v44  ;;  %v748_v54 = vrot.slane %v747_v45, 1 }
 0x253   : > { %v834_v55 = vsel %vm833_vm8, %v728_v47, %v832_v51  ;;  %v754_v57 = vmax.f32 %v752_v38, %v753_v46  ;;  %v757_v58 = vsel %vm700_vm5, %v657_v4, -inf  ;;  %v764_v59 = vsel %vm700_vm5, %v665_v49, -inf }
 0x254   : > { %v735_v60 = vmax.f32 %v733_v43, %v734_v52  ;;  %v741_v61 = vrot.slane %v740_v53, 1  ;;  %v749_v62 = vmax.f32 %v747_v45, %v748_v54  ;;  %v758_v63 = vrot.slane %v757_v58, 4 }
 0x255   : > { %v755_v0 = vrot.slane %v754_v57, 1  ;;  %v765_v1 = vrot.slane %v764_v59, 4  ;;  %v771_v2 = vsel %vm700_vm5, %v664_v42, -inf  ;;  %v778_v3 = vsel %vm700_vm5, %v666_v50, -inf }
 0x256   : > { %v742_v5 = vmax.f32 %v740_v53, %v741_v61  ;;  %v836_v6 = vsel %vm835_vm9, %v735_v60, %v834_v55  ;;  %v759_v7 = vmax.f32 %v757_v58, %v758_v63  ;;  %v772_v8 = vrot.slane %v771_v2, 4 }
 0x257   : > { %v756_v9 = vmax.f32 %v754_v57, %v755_v0  ;;  %v766_v4 = vmax.f32 %v764_v59, %v765_v1  ;;  %v779_v10 = vrot.slane %v778_v3, 4  ;;  %v607_v11 = vadd.f32 1.0, %v1058_v29 }
 0x258   : > { %v838_v12 = vsel %vm837_vm10, %v742_v5, %v836_v6  ;;  %v760_v13 = vrot.slane %v759_v7, 2  ;;  %v773_v14 = vmax.f32 %v771_v2, %v772_v8 }
 0x259   : > { %v840_v15 = vsel %vm839_vm11, %v749_v62, %v838_v12  ;;  %v767_v16 = vrot.slane %v766_v4, 2  ;;  %v780_v17 = vmax.f32 %v778_v3, %v779_v10  ;;  %v611_v18 = vmul.f32 %v607_v11, %v1186_v56 }
 0x25a   : > { %v842_v19 = vsel %vm841_vm12, %v756_v9, %v840_v15  ;;  %v761_v20 = vmax.f32 %v759_v7, %v760_v13  ;;  %v774_v21 = vrot.slane %v773_v14, 2 }
 0x25b   : > { %852 = vst.msk [vmem:[%s1212_s16] sm:$0xff] %vm516_vm4, %v842_v19  ;;  %v768_v22 = vmax.f32 %v766_v4, %v767_v16  ;;  %v781_v23 = vrot.slane %v780_v17, 2  ;;  %v667_v24 = vcombine.high %v611_v18, %v611_v18  ;;  %v674_v25 = vrot.slane %v611_v18, %v1181_v37 }
 0x25c   : > { %v762_v26 = vrot.slane %v761_v20, 1  ;;  %v775_v27 = vmax.f32 %v773_v14, %v774_v21 }
 0x25d   : > { %v769_v28 = vrot.slane %v768_v22, 1  ;;  %v782_v29 = vmax.f32 %v780_v17, %v781_v23  ;;  %v681_v30 = vrot.slane %v667_v24, %v1181_v37  ;;  %v682_v31 = vcombine.high %v674_v25, %v674_v25 }
 0x25e   : > { %v776_v32 = vrot.slane %v775_v27, 1  ;;  %v785_v56 = vsel %vm700_vm5, %v674_v25, -inf  ;;  %v763_v36 = vmax.f32 %v761_v20, %v762_v26 }
 0x25f   : > { %v770_v33 = vmax.f32 %v768_v22, %v769_v28  ;;  %v683_v34 = vcombine.high %v681_v30, %v681_v30  ;;  %v786_v35 = vrot.slane %v785_v56, 4  ;;  %v783_v38 = vrot.slane %v782_v29, 1 }
 0x260   : > { %v792_v39 = vsel %vm700_vm5, %v682_v31, -inf  ;;  %v799_v40 = vsel %vm700_vm5, %v681_v30, -inf  ;;  %v777_v41 = vmax.f32 %v775_v27, %v776_v32 }
 0x261   : > { %v787_v42 = vmax.f32 %v785_v56, %v786_v35  ;;  %v793_v43 = vrot.slane %v792_v39, 4  ;;  %v843_v44 = vsel %vm829_vm6, %v770_v33, %v763_v36  ;;  %v800_v45 = vrot.slane %v799_v40, 4 }
 0x262   : > { %v806_v37 = vsel %vm700_vm5, %v683_v34, -inf  ;;  %v784_v49 = vmax.f32 %v782_v29, %v783_v38  ;;  %v844_v51 = vsel %vm831_vm7, %v777_v41, %v843_v44 }
 0x263   : > { %v788_v46 = vrot.slane %v787_v42, 2  ;;  %v794_v47 = vmax.f32 %v792_v39, %v793_v43  ;;  %v807_v48 = vrot.slane %v806_v37, 4  ;;  %v801_v50 = vmax.f32 %v799_v40, %v800_v45 }
 0x264   : > { %v845_v60 = vsel %vm833_vm8, %v784_v49, %v844_v51 }
 0x265   : > { %v789_v52 = vmax.f32 %v787_v42, %v788_v46  ;;  %v795_v53 = vrot.slane %v794_v47, 2  ;;  %v808_v54 = vmax.f32 %v806_v37, %v807_v48  ;;  %v802_v55 = vrot.slane %v801_v50, 2 }
 0x267   : > { %v790_v57 = vrot.slane %v789_v52, 1  ;;  %v796_v58 = vmax.f32 %v794_v47, %v795_v53  ;;  %v809_v59 = vrot.slane %v808_v54, 2  ;;  %v803_v61 = vmax.f32 %v801_v50, %v802_v55 }
 0x269   : > { %v791_v62 = vmax.f32 %v789_v52, %v790_v57  ;;  %v797_v63 = vrot.slane %v796_v58, 1  ;;  %v810_v0 = vmax.f32 %v808_v54, %v809_v59  ;;  %v804_v1 = vrot.slane %v803_v61, 1 }
 0x26b   : > { %v798_v2 = vmax.f32 %v796_v58, %v797_v63  ;;  %v811_v3 = vrot.slane %v810_v0, 1  ;;  %v846_v5 = vsel %vm835_vm9, %v791_v62, %v845_v60  ;;  %v805_v6 = vmax.f32 %v803_v61, %v804_v1 }
 0x26d   : > { %v812_v7 = vmax.f32 %v810_v0, %v811_v3  ;;  %v847_v8 = vsel %vm837_vm10, %v798_v2, %v846_v5 }
 0x26e   : > { %v848_v9 = vsel %vm839_vm11, %v805_v6, %v847_v8 }
 0x26f   : > { %v849_v4 = vsel %vm841_vm12, %v812_v7, %v848_v9 }
 0x270   : > { %853 = vst.msk [vmem:[%s1212_s16 + $0x8] sm:$0xff] %vm516_vm4, %v849_v4 }
 0x271 PF: > { %s15_s20 = sadd.s32 1, %s1081_s20   ;;  %s1250_s18 = smov %s1077_s19 }
 0x272   : > { %p12_p5 = scmp.ge.s32.totalorder %s15_s20, 4   ;;  %s1251_s19 = smov %s1253_s21 }
 0x274   :  { %14 = sbr.rel (!%p12_p5) target bundleno = 2 (0x2), region = 75 }

</bundles_post_ra>
